<compile_context>
chip_gen: v7x
topology: tpu7x:2x2x1
jax: 0.10.0
libtpu: 0.0.40
codegen_flags: <defaults>
</compile_context>

<pallas_src>
import functools

import jax
import jax.numpy as jnp
from jax.experimental import pallas as pl
from jax.experimental.pallas import tpu as pltpu

HIDDEN = 128
TILE_B_TARGET = 512          # 512-1024 recommended; amortizes per-step overhead


def _round_up(x, m):
    return ((x + m - 1) // m) * m


def _leaky_relu(x, slope=0.01):
    return jnp.where(x > 0, x, slope * x)


def _elu(x, alpha=0.1):
    # exp only on the non-positive branch -> no overflow on the unselected side.
    return jnp.where(x > 0, x, alpha * (jnp.exp(jnp.minimum(x, 0.0)) - 1.0))


def _vmem_capacity_bytes():
    """Per-generation physical VMEM (64 MiB v7x, 128 MiB v5e/v6e)."""
    try:
        cap = getattr(pltpu.get_tpu_info(), "vmem_capacity_bytes", None)
        if cap:
            return int(cap)
    except Exception:
        pass
    return 64 << 20          # conservative fallback (v7x per-core VMEM)


def _mlp_kernel(x_ref,
                w1_ref, b1_ref, w2_ref, b2_ref, w3_ref, b3_ref,
                w4_ref, b4_ref, w5_ref, b5_ref,
                o_ref, *, num_sub, sub_b):
    """One batch tile. Weight/bias refs hold the full (resident) matrices."""
    # Independent batch sub-tiles: their 5-dot chains have no mutual data
    # dependence, so the scheduler overlaps them on the MXU.
    hs = [x_ref[pl.ds(s * sub_b, sub_b), :].astype(jnp.bfloat16)
          for s in range(num_sub)]

    for w_ref, b_ref in ((w1_ref, b1_ref), (w2_ref, b2_ref),
                         (w3_ref, b3_ref), (w4_ref, b4_ref)):
        w = w_ref[...]                       # bf16, loaded once per layer
        b = b_ref[...]                       # f32 (1, 128)
        hs = [
            _leaky_relu(
                jnp.dot(h, w, preferred_element_type=jnp.float32) + b
            ).astype(jnp.bfloat16)
            for h in hs
        ]

    w5 = w5_ref[...]
    b5 = b5_ref[...]
    for s in range(num_sub):
        y = jnp.dot(hs[s], w5, preferred_element_type=jnp.float32) + b5
        o_ref[pl.ds(s * sub_b, sub_b), :] = _elu(y)


def _tile_geometry(B, in_dim, out_pad, vmem_cap):
    """Pick the batch tile from the per-generation VMEM budget."""
    budget = int(0.70 * vmem_cap)
    # Resident weights/biases (double-buffered by the default pipeliner).
    w_bytes = 2 * ((in_dim * HIDDEN + 3 * HIDDEN * HIDDEN + HIDDEN * out_pad) * 2
                   + (4 * HIDDEN + out_pad) * 4)
    # Per batch-row VMEM: x (f32, 2 bufs) + out (f32, 2 bufs) + activation headroom.
    per_row = 2 * 4 * in_dim + 2 * 4 * out_pad + 16 * HIDDEN
    cap_rows = max((budget - w_bytes) // per_row, 8)
    tile_b = max(8, (min(TILE_B_TARGET, cap_rows) // 8) * 8)

    if B <= tile_b:
        # Single tile: shrink to the batch (full-dim blocks are always legal).
        tile_b = B if B <= 8 else _round_up(B, 8)
    elif B < 2 * tile_b:
        # Two roughly-equal tiles so "parallel" feeds both v7x TensorCores.
        tile_b = _round_up(-(-B // 2), 8)

    # 2 overlapped MXU chains only when sub_b >= 128 (keeps vregs in check).
    num_sub = 2 if (tile_b >= 256 and tile_b % 16 == 0) else 1
    sub_b = tile_b // num_sub
    return tile_b, num_sub, sub_b, w_bytes


@jax.jit
def dote_forward(x, params):
    """x: (B, ...) any trailing shape. params: list of (W, b), W shaped (in, out)."""
    B = x.shape[0]
    x2d = x.reshape(B, -1).astype(jnp.float32)     # nn.Flatten(); f32 straight to kernel
    in_dim = x2d.shape[1]

    (w1, b1), (w2, b2), (w3, b3), (w4, b4), (w5, b5) = params
    out_dim = w5.shape[1]
    out_pad = _round_up(out_dim, 128)              # lane-dense output stores

    vmem_cap = _vmem_capacity_bytes()
    tile_b, num_sub, sub_b, w_bytes = _tile_geometry(B, in_dim, out_pad, vmem_cap)

    b_pad = _round_up(B, tile_b)
    if b_pad != B:                                 # only when tile_b doesn't divide B
        x2d = jnp.pad(x2d, ((0, b_pad - B), (0, 0)))
    num_tiles = b_pad // tile_b

    # Weights -> bf16 MXU inputs (biases stay f32).  Only the output layer
    # needs lane padding; x / w1 keep the raw feature dim (no feature pad copy).
    w1p = w1.astype(jnp.bfloat16)
    w2p = w2.astype(jnp.bfloat16)
    w3p = w3.astype(jnp.bfloat16)
    w4p = w4.astype(jnp.bfloat16)
    w5p = jnp.pad(w5.astype(jnp.bfloat16), ((0, 0), (0, out_pad - out_dim)))
    b1p = b1.reshape(1, -1).astype(jnp.float32)
    b2p = b2.reshape(1, -1).astype(jnp.float32)
    b3p = b3.reshape(1, -1).astype(jnp.float32)
    b4p = b4.reshape(1, -1).astype(jnp.float32)
    b5p = jnp.pad(b5.reshape(1, -1).astype(jnp.float32),
                  ((0, 0), (0, out_pad - out_dim)))

    # ---- block specs -------------------------------------------------------
    x_spec = pl.BlockSpec((tile_b, in_dim), lambda i: (i, 0))
    resident = lambda shape: pl.BlockSpec(shape, lambda i: (0, 0))  # fetched once
    in_specs = [
        x_spec,
        resident((in_dim, HIDDEN)), resident((1, HIDDEN)),
        resident((HIDDEN, HIDDEN)), resident((1, HIDDEN)),
        resident((HIDDEN, HIDDEN)), resident((1, HIDDEN)),
        resident((HIDDEN, HIDDEN)), resident((1, HIDDEN)),
        resident((HIDDEN, out_pad)), resident((1, out_pad)),
    ]
    out_spec = pl.BlockSpec((tile_b, out_pad), lambda i: (i, 0))

    # ---- VMEM budget: actual footprint + slack, capped below physical ------
    io_bytes = 2 * tile_b * (in_dim * 4 + out_pad * 4)   # double-buffered tiles
    act_bytes = tile_b * HIDDEN * 8                      # layer intermediates
    vmem_limit = int(min(max(int(1.3 * (w_bytes + io_bytes + act_bytes)), 16 << 20),
                         int(0.9 * vmem_cap)))

    # ---- cost estimate ------------------------------------------------------
    flops = 2 * b_pad * (in_dim * HIDDEN + 3 * HIDDEN * HIDDEN + HIDDEN * out_pad)
    cost = pl.CostEstimate(
        flops=flops,
        transcendentals=b_pad * out_pad,
        bytes_accessed=b_pad * in_dim * 4 + w_bytes // 2 + b_pad * out_pad * 4,
    )

    kernel = functools.partial(_mlp_kernel, num_sub=num_sub, sub_b=sub_b)

    out_padded = pl.pallas_call(
        kernel,
        out_shape=jax.ShapeDtypeStruct((b_pad, out_pad), jnp.float32),
        grid=(num_tiles,),
        in_specs=in_specs,
        out_specs=out_spec,
        compiler_params=pltpu.CompilerParams(
            dimension_semantics=("parallel",),   # megacore-shard batch tiles (v7x)
            vmem_limit_bytes=vmem_limit,
        ),
        cost_estimate=cost,
    )(x2d, w1p, b1p, w2p, b2p, w3p, b3p, w4p, b4p, w5p, b5p)

    return out_padded[:B, :out_dim]


def init_params(key, input_dim, output_dim, hidden=HIDDEN):
    """nn.Linear-style init. Stored as W (in, out) and b (1, out) for the kernel."""
    dims = [(input_dim, hidden), (hidden, hidden), (hidden, hidden),
            (hidden, hidden), (hidden, output_dim)]
    params = []
    for din, dout in dims:
        kw, kb, key = jax.random.split(key, 3)
        bound = 1.0 / jnp.sqrt(din)
        w = jax.random.uniform(kw, (dout, din), jnp.float32, -bound, bound)  # torch layout
        b = jax.random.uniform(kb, (dout,), jnp.float32, -bound, bound)
        params.append((jnp.transpose(w), b.reshape(1, dout)))
    return params


def _reference(x, params, matmul_dtype=jnp.float32):
    """Pure-JAX reference. matmul_dtype=bf16 mirrors the kernel's cast points."""
    B = x.shape[0]
    h = x.reshape(B, -1).astype(jnp.float32)
    for i, (w, b) in enumerate(params):
        y = jnp.dot(h.astype(matmul_dtype), w.astype(matmul_dtype),
                    preferred_element_type=jnp.float32) + b.reshape(1, -1)
        h = _leaky_relu(y) if i < len(params) - 1 else _elu(y)
    return h


if __name__ == "__main__":
    key = jax.random.PRNGKey(0)
    kx, kp = jax.random.split(key)

    # Small shapes consistent with the module: batch=8, flattened input_dim=256.
    B, C, H, W = 8, 4, 8, 8
    input_dim = C * H * W                                   # 256
    output_dim = 128

    x = jax.random.normal(kx, (B, C, H, W), jnp.float32)
    params = init_params(kp, input_dim, output_dim)

    out = dote_forward(x, params)
    jax.block_until_ready(out)
    assert out.shape == (B, output_dim)

    # Tight check against a reference with the same bf16 matmul-input casts.
    ref_bf16 = _reference(x, params, matmul_dtype=jnp.bfloat16)
    assert jnp.allclose(out, ref_bf16, atol=1e-2, rtol=1e-2), \
        "mismatch vs bf16-matmul reference"

    # Looser check against the full-f32 PyTorch-equivalent reference.
    ref_f32 = _reference(x, params, matmul_dtype=jnp.float32)
    assert jnp.allclose(out, ref_f32, atol=1e-1, rtol=5e-2), \
        "mismatch vs f32 reference"

    print("KERNEL_OK")
</pallas_src>

<mosaic_0001>
module attributes {stable_mosaic.version = 11 : i64} {
  func.func @_mlp_kernel(%arg0: i32, %arg1: memref<8x256xf32, #tpu.memory_space<vmem>>, %arg2: memref<256x128xbf16, #tpu.memory_space<vmem>>, %arg3: memref<1x128xf32, #tpu.memory_space<vmem>>, %arg4: memref<128x128xbf16, #tpu.memory_space<vmem>>, %arg5: memref<1x128xf32, #tpu.memory_space<vmem>>, %arg6: memref<128x128xbf16, #tpu.memory_space<vmem>>, %arg7: memref<1x128xf32, #tpu.memory_space<vmem>>, %arg8: memref<128x128xbf16, #tpu.memory_space<vmem>>, %arg9: memref<1x128xf32, #tpu.memory_space<vmem>>, %arg10: memref<128x128xbf16, #tpu.memory_space<vmem>>, %arg11: memref<1x128xf32, #tpu.memory_space<vmem>>, %arg12: memref<8x128xf32, #tpu.memory_space<vmem>>) attributes {dimension_semantics = [#tpu.dimension_semantics<parallel>], iteration_bounds = array<i64: 1>, scalar_prefetch = 0 : i64, scratch_operands = 0 : i64, tpu.core_type = #tpu.core_type<tc>, window_params = [{transform_indices = @transform_0, window_bounds = array<i64: 8, 256>}, {pipeline_mode = #tpu.pipeline_mode<synchronous>, transform_indices = @transform_1, window_bounds = array<i64: 256, 128>}, {pipeline_mode = #tpu.pipeline_mode<synchronous>, transform_indices = @transform_2, window_bounds = array<i64: 1, 128>}, {pipeline_mode = #tpu.pipeline_mode<synchronous>, transform_indices = @transform_3, window_bounds = array<i64: 128, 128>}, {pipeline_mode = #tpu.pipeline_mode<synchronous>, transform_indices = @transform_4, window_bounds = array<i64: 1, 128>}, {pipeline_mode = #tpu.pipeline_mode<synchronous>, transform_indices = @transform_5, window_bounds = array<i64: 128, 128>}, {pipeline_mode = #tpu.pipeline_mode<synchronous>, transform_indices = @transform_6, window_bounds = array<i64: 1, 128>}, {pipeline_mode = #tpu.pipeline_mode<synchronous>, transform_indices = @transform_7, window_bounds = array<i64: 128, 128>}, {pipeline_mode = #tpu.pipeline_mode<synchronous>, transform_indices = @transform_8, window_bounds = array<i64: 1, 128>}, {pipeline_mode = #tpu.pipeline_mode<synchronous>, transform_indices = @transform_9, window_bounds = array<i64: 128, 128>}, {pipeline_mode = #tpu.pipeline_mode<synchronous>, transform_indices = @transform_10, window_bounds = array<i64: 1, 128>}, {transform_indices = @transform_11, window_bounds = array<i64: 8, 128>}]} {
    %c0 = arith.constant 0 : index
    %c0_0 = arith.constant 0 : index
    %0 = vector.load %arg1[%c0, %c0_0] : memref<8x256xf32, #tpu.memory_space<vmem>>, vector<8x256xf32>
    %1 = arith.truncf %0 : vector<8x256xf32> to vector<8x256xbf16>
    %c0_1 = arith.constant 0 : index
    %c0_2 = arith.constant 0 : index
    %2 = vector.load %arg2[%c0_1, %c0_2] : memref<256x128xbf16, #tpu.memory_space<vmem>>, vector<256x128xbf16>
    %c0_3 = arith.constant 0 : index
    %c0_4 = arith.constant 0 : index
    %3 = vector.load %arg3[%c0_3, %c0_4] : memref<1x128xf32, #tpu.memory_space<vmem>>, vector<1x128xf32>
    %cst = arith.constant dense<0.000000e+00> : vector<8x128xf32>
    %4 = tpu.matmul %1, %2, %cst {dimension_numbers = #tpu.dot_dimension_numbers<[1], [0], [0], [1], [0, 0, 1, 1], [], []>} : vector<8x256xbf16>, vector<256x128xbf16>, vector<8x128xf32> -> vector<8x128xf32>
    %5 = vector.broadcast %3 : vector<1x128xf32> to vector<8x128xf32>
    %6 = arith.addf %4, %5 : vector<8x128xf32>
    %cst_5 = arith.constant 0.000000e+00 : f32
    %7 = vector.broadcast %cst_5 : f32 to vector<8x128xf32>
    %8 = arith.cmpf ogt, %6, %7 : vector<8x128xf32>
    %cst_6 = arith.constant 0.00999999977 : f32
    %9 = vector.broadcast %cst_6 : f32 to vector<8x128xf32>
    %10 = arith.mulf %9, %6 : vector<8x128xf32>
    %11 = arith.select %8, %6, %10 : vector<8x128xi1>, vector<8x128xf32>
    %12 = arith.truncf %11 : vector<8x128xf32> to vector<8x128xbf16>
    %c0_7 = arith.constant 0 : index
    %c0_8 = arith.constant 0 : index
    %13 = vector.load %arg4[%c0_7, %c0_8] : memref<128x128xbf16, #tpu.memory_space<vmem>>, vector<128x128xbf16>
    %c0_9 = arith.constant 0 : index
    %c0_10 = arith.constant 0 : index
    %14 = vector.load %arg5[%c0_9, %c0_10] : memref<1x128xf32, #tpu.memory_space<vmem>>, vector<1x128xf32>
    %cst_11 = arith.constant dense<0.000000e+00> : vector<8x128xf32>
    %15 = tpu.matmul %12, %13, %cst_11 {dimension_numbers = #tpu.dot_dimension_numbers<[1], [0], [0], [1], [0, 0, 1, 1], [], []>} : vector<8x128xbf16>, vector<128x128xbf16>, vector<8x128xf32> -> vector<8x128xf32>
    %16 = vector.broadcast %14 : vector<1x128xf32> to vector<8x128xf32>
    %17 = arith.addf %15, %16 : vector<8x128xf32>
    %cst_12 = arith.constant 0.000000e+00 : f32
    %18 = vector.broadcast %cst_12 : f32 to vector<8x128xf32>
    %19 = arith.cmpf ogt, %17, %18 : vector<8x128xf32>
    %cst_13 = arith.constant 0.00999999977 : f32
    %20 = vector.broadcast %cst_13 : f32 to vector<8x128xf32>
    %21 = arith.mulf %20, %17 : vector<8x128xf32>
    %22 = arith.select %19, %17, %21 : vector<8x128xi1>, vector<8x128xf32>
    %23 = arith.truncf %22 : vector<8x128xf32> to vector<8x128xbf16>
    %c0_14 = arith.constant 0 : index
    %c0_15 = arith.constant 0 : index
    %24 = vector.load %arg6[%c0_14, %c0_15] : memref<128x128xbf16, #tpu.memory_space<vmem>>, vector<128x128xbf16>
    %c0_16 = arith.constant 0 : index
    %c0_17 = arith.constant 0 : index
    %25 = vector.load %arg7[%c0_16, %c0_17] : memref<1x128xf32, #tpu.memory_space<vmem>>, vector<1x128xf32>
    %cst_18 = arith.constant dense<0.000000e+00> : vector<8x128xf32>
    %26 = tpu.matmul %23, %24, %cst_18 {dimension_numbers = #tpu.dot_dimension_numbers<[1], [0], [0], [1], [0, 0, 1, 1], [], []>} : vector<8x128xbf16>, vector<128x128xbf16>, vector<8x128xf32> -> vector<8x128xf32>
    %27 = vector.broadcast %25 : vector<1x128xf32> to vector<8x128xf32>
    %28 = arith.addf %26, %27 : vector<8x128xf32>
    %cst_19 = arith.constant 0.000000e+00 : f32
    %29 = vector.broadcast %cst_19 : f32 to vector<8x128xf32>
    %30 = arith.cmpf ogt, %28, %29 : vector<8x128xf32>
    %cst_20 = arith.constant 0.00999999977 : f32
    %31 = vector.broadcast %cst_20 : f32 to vector<8x128xf32>
    %32 = arith.mulf %31, %28 : vector<8x128xf32>
    %33 = arith.select %30, %28, %32 : vector<8x128xi1>, vector<8x128xf32>
    %34 = arith.truncf %33 : vector<8x128xf32> to vector<8x128xbf16>
    %c0_21 = arith.constant 0 : index
    %c0_22 = arith.constant 0 : index
    %35 = vector.load %arg8[%c0_21, %c0_22] : memref<128x128xbf16, #tpu.memory_space<vmem>>, vector<128x128xbf16>
    %c0_23 = arith.constant 0 : index
    %c0_24 = arith.constant 0 : index
    %36 = vector.load %arg9[%c0_23, %c0_24] : memref<1x128xf32, #tpu.memory_space<vmem>>, vector<1x128xf32>
    %cst_25 = arith.constant dense<0.000000e+00> : vector<8x128xf32>
    %37 = tpu.matmul %34, %35, %cst_25 {dimension_numbers = #tpu.dot_dimension_numbers<[1], [0], [0], [1], [0, 0, 1, 1], [], []>} : vector<8x128xbf16>, vector<128x128xbf16>, vector<8x128xf32> -> vector<8x128xf32>
    %38 = vector.broadcast %36 : vector<1x128xf32> to vector<8x128xf32>
    %39 = arith.addf %37, %38 : vector<8x128xf32>
    %cst_26 = arith.constant 0.000000e+00 : f32
    %40 = vector.broadcast %cst_26 : f32 to vector<8x128xf32>
    %41 = arith.cmpf ogt, %39, %40 : vector<8x128xf32>
    %cst_27 = arith.constant 0.00999999977 : f32
    %42 = vector.broadcast %cst_27 : f32 to vector<8x128xf32>
    %43 = arith.mulf %42, %39 : vector<8x128xf32>
    %44 = arith.select %41, %39, %43 : vector<8x128xi1>, vector<8x128xf32>
    %45 = arith.truncf %44 : vector<8x128xf32> to vector<8x128xbf16>
    %c0_28 = arith.constant 0 : index
    %c0_29 = arith.constant 0 : index
    %46 = vector.load %arg10[%c0_28, %c0_29] : memref<128x128xbf16, #tpu.memory_space<vmem>>, vector<128x128xbf16>
    %c0_30 = arith.constant 0 : index
    %c0_31 = arith.constant 0 : index
    %47 = vector.load %arg11[%c0_30, %c0_31] : memref<1x128xf32, #tpu.memory_space<vmem>>, vector<1x128xf32>
    %cst_32 = arith.constant dense<0.000000e+00> : vector<8x128xf32>
    %48 = tpu.matmul %45, %46, %cst_32 {dimension_numbers = #tpu.dot_dimension_numbers<[1], [0], [0], [1], [0, 0, 1, 1], [], []>} : vector<8x128xbf16>, vector<128x128xbf16>, vector<8x128xf32> -> vector<8x128xf32>
    %49 = vector.broadcast %47 : vector<1x128xf32> to vector<8x128xf32>
    %50 = arith.addf %48, %49 : vector<8x128xf32>
    %cst_33 = arith.constant 0.000000e+00 : f32
    %51 = vector.broadcast %cst_33 : f32 to vector<8x128xf32>
    %52 = arith.cmpf ogt, %50, %51 : vector<8x128xf32>
    %cst_34 = arith.constant 0.000000e+00 : f32
    %53 = vector.broadcast %cst_34 : f32 to vector<8x128xf32>
    %54 = arith.minimumf %50, %53 : vector<8x128xf32>
    %55 = math.exp %54 : vector<8x128xf32>
    %cst_35 = arith.constant 1.000000e+00 : f32
    %56 = vector.broadcast %cst_35 : f32 to vector<8x128xf32>
    %57 = arith.subf %55, %56 : vector<8x128xf32>
    %cst_36 = arith.constant 1.000000e-01 : f32
    %58 = vector.broadcast %cst_36 : f32 to vector<8x128xf32>
    %59 = arith.mulf %58, %57 : vector<8x128xf32>
    %60 = arith.select %52, %50, %59 : vector<8x128xi1>, vector<8x128xf32>
    %c0_37 = arith.constant 0 : index
    %c0_38 = arith.constant 0 : index
    %61 = vector.load %arg12[%c0_37, %c0_38] : memref<8x128xf32, #tpu.memory_space<vmem>>, vector<8x128xf32>
    tpu.vector_store %arg12[%c0_37, %c0_38], %60 {strides = array<i32>} : memref<8x128xf32, #tpu.memory_space<vmem>>, vector<8x128xf32>,
    return
  }
  func.func @transform_0(%arg0: i32) -> (i32, i32) {
    %c0_i32 = arith.constant 0 : i32
    %c0_i32_0 = arith.constant 0 : i32
    return %arg0, %c0_i32 : i32, i32
  }
  func.func @transform_1(%arg0: i32) -> (i32, i32) {
    %c0_i32 = arith.constant 0 : i32
    %c0_i32_0 = arith.constant 0 : i32
    %c0_i32_1 = arith.constant 0 : i32
    return %c0_i32, %c0_i32_0 : i32, i32
  }
  func.func @transform_2(%arg0: i32) -> (i32, i32) {
    %c0_i32 = arith.constant 0 : i32
    %c0_i32_0 = arith.constant 0 : i32
    %c0_i32_1 = arith.constant 0 : i32
    return %c0_i32, %c0_i32_0 : i32, i32
  }
  func.func @transform_3(%arg0: i32) -> (i32, i32) {
    %c0_i32 = arith.constant 0 : i32
    %c0_i32_0 = arith.constant 0 : i32
    %c0_i32_1 = arith.constant 0 : i32
    return %c0_i32, %c0_i32_0 : i32, i32
  }
  func.func @transform_4(%arg0: i32) -> (i32, i32) {
    %c0_i32 = arith.constant 0 : i32
    %c0_i32_0 = arith.constant 0 : i32
    %c0_i32_1 = arith.constant 0 : i32
    return %c0_i32, %c0_i32_0 : i32, i32
  }
  func.func @transform_5(%arg0: i32) -> (i32, i32) {
    %c0_i32 = arith.constant 0 : i32
    %c0_i32_0 = arith.constant 0 : i32
    %c0_i32_1 = arith.constant 0 : i32
    return %c0_i32, %c0_i32_0 : i32, i32
  }
  func.func @transform_6(%arg0: i32) -> (i32, i32) {
    %c0_i32 = arith.constant 0 : i32
    %c0_i32_0 = arith.constant 0 : i32
    %c0_i32_1 = arith.constant 0 : i32
    return %c0_i32, %c0_i32_0 : i32, i32
  }
  func.func @transform_7(%arg0: i32) -> (i32, i32) {
    %c0_i32 = arith.constant 0 : i32
    %c0_i32_0 = arith.constant 0 : i32
    %c0_i32_1 = arith.constant 0 : i32
    return %c0_i32, %c0_i32_0 : i32, i32
  }
  func.func @transform_8(%arg0: i32) -> (i32, i32) {
    %c0_i32 = arith.constant 0 : i32
    %c0_i32_0 = arith.constant 0 : i32
    %c0_i32_1 = arith.constant 0 : i32
    return %c0_i32, %c0_i32_0 : i32, i32
  }
  func.func @transform_9(%arg0: i32) -> (i32, i32) {
    %c0_i32 = arith.constant 0 : i32
    %c0_i32_0 = arith.constant 0 : i32
    %c0_i32_1 = arith.constant 0 : i32
    return %c0_i32, %c0_i32_0 : i32, i32
  }
  func.func @transform_10(%arg0: i32) -> (i32, i32) {
    %c0_i32 = arith.constant 0 : i32
    %c0_i32_0 = arith.constant 0 : i32
    %c0_i32_1 = arith.constant 0 : i32
    return %c0_i32, %c0_i32_0 : i32, i32
  }
  func.func @transform_11(%arg0: i32) -> (i32, i32) {
    %c0_i32 = arith.constant 0 : i32
    %c0_i32_0 = arith.constant 0 : i32
    return %arg0, %c0_i32 : i32, i32
  }
}

</mosaic_0001>

<bundles_post_ra>
// kernel: dote_forward.1
= control target key start
LH: loop header
LB: loop body
LE: loop exit
PB: predicated region body
PF: predicated region fallthrough
CT: control target
= control target key end

     0   :  { %v970_v2 = vmov 0.0   ;;  %s1250_s0 = inlined_call_operand.vmem [shape: f32[8,256], index: 0, kind: input, shape index: {}]   ;;  %s1251_s1 = inlined_call_operand.vmem [shape: bf16[256,128], index: 1, kind: input, shape index: {}]   ;;  %s1252_s2 = inlined_call_operand.vmem [shape: f32[1,128], index: 2, kind: input, shape index: {}]   ;;  %s1253_s3 = inlined_call_operand.vmem [shape: bf16[128,128], index: 3, kind: input, shape index: {}]   ;;  %s1254_s4 = inlined_call_operand.vmem [shape: f32[1,128], index: 4, kind: input, shape index: {}]   ;;  %s1255_s5 = inlined_call_operand.vmem [shape: bf16[128,128], index: 5, kind: input, shape index: {}]   ;;  %s1256_s6 = inlined_call_operand.vmem [shape: f32[1,128], index: 6, kind: input, shape index: {}]   ;;  %s1257_s7 = inlined_call_operand.vmem [shape: bf16[128,128], index: 7, kind: input, shape index: {}]   ;;  %s1258_s8 = inlined_call_operand.vmem [shape: f32[1,128], index: 8, kind: input, shape index: {}]   ;;  %s1259_s9 = inlined_call_operand.vmem [shape: bf16[128,128], index: 9, kind: input, shape index: {}]   ;;  %s1260_s10 = inlined_call_operand.vmem [shape: f32[1,128], index: 10, kind: input, shape index: {}]   ;;  %s1261_s11 = inlined_call_operand.hbm [shape: f32[8,128], index: 11, kind: output, shape index: {}]  }
   0x1   :  { %v896_v0 = vld [vmem:[%s1251_s1 + $0x40] sm:$0xff]   ;;  %813 = vmatprep.subr.bf16.mxu1 %v970_v2  ;;  %v898_v3 = vld [vmem:[%s1251_s1 + $0x48] sm:$0xff]   ;;  %v900_v5 = vld [vmem:[%s1251_s1 + $0x50] sm:$0xff]  }
   0x2   :  { %v897_v1 = vld [vmem:[%s1251_s1] sm:$0xff]   ;;  %755 = vmatprep.subr.bf16.mxu0 %v896_v0  ;;  %v899_v4 = vld [vmem:[%s1251_s1 + $0x8] sm:$0xff]   ;;  %v901_v6 = vld [vmem:[%s1251_s1 + $0x10] sm:$0xff]  }
   0x3   :  { %756 = vmatpush3.bf16.msra.mxu0 %v897_v1  ;;  %v902_v7 = vld [vmem:[%s1251_s1 + $0x58] sm:$0xff]   ;;  %v904_v9 = vld [vmem:[%s1251_s1 + $0x60] sm:$0xff]   ;;  %v906_v11 = vld [vmem:[%s1251_s1 + $0x68] sm:$0xff]  }
   0x4   :  { %757 = vmatprep.subr.bf16.mxu0 %v898_v3  ;;  %v903_v8 = vld [vmem:[%s1251_s1 + $0x18] sm:$0xff]   ;;  %v905_v10 = vld [vmem:[%s1251_s1 + $0x20] sm:$0xff]   ;;  %v41_v12 = vld [vmem:[%s1250_s0 + $0x8] sm:$0xff] }
   0x5   :  { %v43_v13 = vpack.c.bf16 %v41_v12, %v41_v12  ;;  %v912_v14 = vld [vmem:[%s1253_s3] sm:$0xff]   ;;  %v907_v15 = vld [vmem:[%s1251_s1 + $0x28] sm:$0xff]   ;;  %v908_v16 = vld [vmem:[%s1251_s1 + $0x70] sm:$0xff]  }
   0x6   :  { %814 = vmatpush3.bf16.msra.mxu1 %v912_v14  ;;  %v913_v17 = vld [vmem:[%s1253_s3 + $0x8] sm:$0xff]   ;;  %v909_v18 = vld [vmem:[%s1251_s1 + $0x30] sm:$0xff]   ;;  %v910_v19 = vld [vmem:[%s1251_s1 + $0x78] sm:$0xff]  }
   0x7   :  { %758 = vmatpush3.bf16.msra.mxu0 %v899_v4  ;;  %211 = vmatprep.mubr.bf16.mxu0 %v43_v13  ;;  %v914_v20 = vld [vmem:[%s1253_s3 + $0x10] sm:$0xff]   ;;  %v911_v21 = vld [vmem:[%s1251_s1 + $0x38] sm:$0xff]   ;;  %v40_v22 = vld [vmem:[%s1250_s0] sm:$0xff] }
   0x8   :  { %759 = vmatprep.subr.bf16.mxu0 %v900_v5  ;;  %815 = vmatprep.subr.bf16.mxu1 %v970_v2  ;;  %v915_v23 = vld [vmem:[%s1253_s3 + $0x18] sm:$0xff]   ;;  %v42_v24 = vpack.c.bf16 %v40_v22, %v40_v22  ;;  %v916_v25 = vld [vmem:[%s1253_s3 + $0x20] sm:$0xff]  }
   0xa   :  { %816 = vmatpush3.bf16.msra.mxu1 %v913_v17 }
   0xb   :  { %760 = vmatpush3.bf16.msra.mxu0 %v901_v6  ;;  %817 = vmatprep.subr.bf16.mxu1 %v970_v2 }
   0xc   :  { %761 = vmatprep.subr.bf16.mxu0 %v902_v7 }
   0xe   :  { %818 = vmatpush3.bf16.msra.mxu1 %v914_v20 }
   0xf   :  { %762 = vmatpush3.bf16.msra.mxu0 %v903_v8  ;;  %819 = vmatprep.subr.bf16.mxu1 %v970_v2 }
  0x10   :  { %763 = vmatprep.subr.bf16.mxu0 %v904_v9 }
  0x12   :  { %820 = vmatpush3.bf16.msra.mxu1 %v915_v23 }
  0x13   :  { %764 = vmatpush3.bf16.msra.mxu0 %v905_v10  ;;  %821 = vmatprep.subr.bf16.mxu1 %v970_v2 }
  0x14   :  { %765 = vmatprep.subr.bf16.mxu0 %v906_v11 }
  0x16   :  { %822 = vmatpush3.bf16.msra.mxu1 %v916_v25 }
  0x17   :  { %766 = vmatpush3.bf16.msra.mxu0 %v907_v15  ;;  %823 = vmatprep.subr.bf16.mxu1 %v970_v2 }
  0x18   :  { %767 = vmatprep.subr.bf16.mxu0 %v908_v16 }
  0x1b   :  { %768 = vmatpush3.bf16.msra.mxu0 %v909_v18 }
  0x1c   :  { %769 = vmatprep.subr.bf16.mxu0 %v910_v19 }
  0x1f   :  { %770 = vmatpush3.bf16.msra.mxu0 %v911_v21 }
  0x20   :  { %833 = vmatprep.subr.bf16.mxu0 %v970_v2 }
  0x22   :  { %212 = vmatmul.mubr.bf16.vlgmr.msra.gmra.mrb[0].mxu0 %v42_v24 }
  0x23   :  { %16 = vsyncpa [#allocation3], 0  ;;  %v917_v26 = vld [vmem:[%s1253_s3 + $0x28] sm:$0xff]   ;;  %v918_v27 = vld [vmem:[%s1253_s3 + $0x30] sm:$0xff]   ;;  %vm971_vm0 = vmmov 0  }
  0x24   :  { %824 = vmatpush3.bf16.msra.mxu1 %v917_v26  ;;  %v919_v28 = vld [vmem:[%s1253_s3 + $0x38] sm:$0xff]   ;;  %829 = vmatprep.mubr.msk.bf16.mxu1 %vm971_vm0, %v970_v2  ;;  %v920_v29 = vld [vmem:[%s1255_s5] sm:$0xff]   ;;  %v921_v30 = vld [vmem:[%s1255_s5 + $0x8] sm:$0xff]  }
  0x25   :  { %825 = vmatprep.subr.bf16.mxu1 %v970_v2  ;;  %849 = vmatprep.mubr.msk.bf16.mxu0 %vm971_vm0, %v970_v2  ;;  %v922_v31 = vld [vmem:[%s1255_s5 + $0x10] sm:$0xff]   ;;  %v923_v32 = vld [vmem:[%s1255_s5 + $0x18] sm:$0xff]   ;;  %v924_v33 = vld [vmem:[%s1255_s5 + $0x20] sm:$0xff]  }
  0x26   :  { %834 = vmatpush3.bf16.msra.mxu0 %v920_v29  ;;  %v925_v34 = vld [vmem:[%s1255_s5 + $0x28] sm:$0xff]   ;;  %v701_v36 = vld [vmem:[%s1252_s2] ss:$0 sm:$0xff]  ;;  %v926_v45 = vld [vmem:[%s1255_s5 + $0x30] sm:$0xff]  }
  0x27   :  { %835 = vmatprep.subr.bf16.mxu0 %v970_v2  ;;  %v927_v46 = vld [vmem:[%s1255_s5 + $0x38] sm:$0xff]   ;;  %v928_v47 = vld [vmem:[%s1257_s7] sm:$0xff]   ;;  %v929_v48 = vld [vmem:[%s1257_s7 + $0x8] sm:$0xff]  }
  0x28   :  { %826 = vmatpush3.bf16.msra.mxu1 %v918_v27  ;;  %v930_v49 = vld [vmem:[%s1257_s7 + $0x10] sm:$0xff]   ;;  %v931_v50 = vld [vmem:[%s1257_s7 + $0x18] sm:$0xff]   ;;  %v932_v51 = vld [vmem:[%s1257_s7 + $0x20] sm:$0xff]  }
  0x29   :  { %827 = vmatprep.subr.bf16.mxu1 %v970_v2  ;;  %v933_v52 = vld [vmem:[%s1257_s7 + $0x28] sm:$0xff]   ;;  %v718_v53 = vld [vmem:[%s1254_s4] ss:$0 sm:$0xff]  ;;  %v934_v62 = vld [vmem:[%s1257_s7 + $0x30] sm:$0xff]  }
  0x2a   :  { %836 = vmatpush3.bf16.msra.mxu0 %v921_v30  ;;  %v935_v63 = vld [vmem:[%s1257_s7 + $0x38] sm:$0xff]   ;;  %v936_v0 = vld [vmem:[%s1259_s9] sm:$0xff]   ;;  %v937_v1 = vld [vmem:[%s1259_s9 + $0x8] sm:$0xff]  }
  0x2b   :  { %837 = vmatprep.subr.bf16.mxu0 %v970_v2  ;;  %v938_v3 = vld [vmem:[%s1259_s9 + $0x10] sm:$0xff]   ;;  %v939_v4 = vld [vmem:[%s1259_s9 + $0x18] sm:$0xff]   ;;  %v940_v5 = vld [vmem:[%s1259_s9 + $0x20] sm:$0xff]  }
  0x2c   :  { %828 = vmatpush3.bf16.msra.mxu1 %v919_v28  ;;  %v941_v6 = vld [vmem:[%s1259_s9 + $0x28] sm:$0xff]   ;;  %v727_v7 = vld [vmem:[%s1256_s6] ss:$0 sm:$0xff]  ;;  %v942_v16 = vld [vmem:[%s1259_s9 + $0x30] sm:$0xff]  }
  0x2d   :  { %853 = vmatprep.subr.bf16.mxu1 %v970_v2  ;;  %v943_v17 = vld [vmem:[%s1259_s9 + $0x38] sm:$0xff]   ;;  %v736_v18 = vld [vmem:[%s1258_s8] ss:$0 sm:$0xff]  ;;  %s972_s8 = smov [#allocation2]  }
  0x2e   :  { %838 = vmatpush3.bf16.msra.mxu0 %v922_v31  ;;  %s693_s9 = sshll.u32 %s972_s8, 4  ;;  %s694_s9 = int_to_ptr.vmem [resolvable:$true] %s693_s9 }
  0x2f   :  { %839 = vmatprep.subr.bf16.mxu0 %v970_v2  ;;  %s946_s16 = scalar_lea.vmem %s694_s9, 128  ;;  %p951_p1 = scmp.lt.s32.totalorder %s694_s9, %s694_s9 }
  0x30   :  { %p947_p0 = scmp.ne.s32.totalorder %s694_s9, %s946_s16  ;;  %p952_p2 = scmp.lt.s32.totalorder %s946_s16, %s946_s16 }
  0x32   :  { %840 = vmatpush3.bf16.msra.mxu0 %v923_v32  ;;  %p953_p3 = por %p952_p2, %p951_p1 }
  0x33   :  { %841 = vmatprep.subr.bf16.mxu0 %v970_v2 }
  0x34   :  { %p954_p4 = pnand %p953_p3, %p947_p0 }
  0x36   :  { %842 = vmatpush3.bf16.msra.mxu0 %v924_v33 }
  0x37   :  { %843 = vmatprep.subr.bf16.mxu0 %v970_v2 }
  0x3a   :  { %844 = vmatpush3.bf16.msra.mxu0 %v925_v34 }
  0x3b   :  { %845 = vmatprep.subr.bf16.mxu0 %v970_v2 }
  0x3e   :  { %846 = vmatpush3.bf16.msra.mxu0 %v926_v45 }
  0x3f   :  { %847 = vmatprep.subr.bf16.mxu0 %v970_v2 }
  0x42   :  { %848 = vmatpush3.bf16.msra.mxu0 %v927_v46 }
  0x43   :  { %873 = vmatprep.subr.bf16.mxu0 %v970_v2 }
  0xf5   :  { %v771_v35 = vpop.f32.mrb[0].mxu0 }
  0xf6   :  { %v772_v37 = vpop.f32.mrb[1].mxu0 }
  0xf7   :  { %v773_v38 = vadd.f32 %v772_v37, %v771_v35  ;;  %v774_v39 = vpop.f32.mrb[2].mxu0 }
  0xf8   :  { %v775_v40 = vpop.f32.mrb[3].mxu0 }
  0xf9   :  { %v214_v41 = vadd.f32 %v773_v38, %v701_v36 }
  0xfb   :  { %v220_v42 = vmul.f32 0.01, %v214_v41  ;;  %vm219_vm1 = vcmp.gt.f32.partialorder %v214_v41, 0.0 }
  0xfd   :  { %v221_v43 = vsel %vm219_vm1, %v214_v41, %v220_v42 }
  0xfe   :  { %v222_v44 = vpack.c.bf16 %v221_v43, %v221_v43 }
 0x100   :  { %830 = vmatmul.mubr.bf16.vlgmr.msra.gmra.mrb[0].mxu1 %v222_v44 }
 0x101   :  { %869 = vmatprep.mubr.msk.bf16.mxu1 %vm971_vm0, %v970_v2  ;;  %854 = vmatpush3.bf16.msra.mxu1 %v928_v47 }
 0x102   :  { %855 = vmatprep.subr.bf16.mxu1 %v970_v2 }
 0x105   :  { %856 = vmatpush3.bf16.msra.mxu1 %v929_v48 }
 0x106   :  { %857 = vmatprep.subr.bf16.mxu1 %v970_v2 }
 0x109   :  { %858 = vmatpush3.bf16.msra.mxu1 %v930_v49 }
 0x10a   :  { %859 = vmatprep.subr.bf16.mxu1 %v970_v2 }
 0x10d   :  { %860 = vmatpush3.bf16.msra.mxu1 %v931_v50 }
 0x10e   :  { %861 = vmatprep.subr.bf16.mxu1 %v970_v2 }
 0x111   :  { %862 = vmatpush3.bf16.msra.mxu1 %v932_v51 }
 0x112   :  { %863 = vmatprep.subr.bf16.mxu1 %v970_v2 }
 0x115   :  { %864 = vmatpush3.bf16.msra.mxu1 %v933_v52 }
 0x116   :  { %865 = vmatprep.subr.bf16.mxu1 %v970_v2 }
 0x119   :  { %866 = vmatpush3.bf16.msra.mxu1 %v934_v62 }
 0x11a   :  { %867 = vmatprep.subr.bf16.mxu1 %v970_v2 }
 0x11d   :  { %868 = vmatpush3.bf16.msra.mxu1 %v935_v63 }
 0x1d3   :  { %v328_v54 = vpop.f32.mrb[0].mxu1 }
 0x1d4   :  { %v329_v55 = vadd.f32 %v718_v53, %v328_v54  ;;  %v831_v56 = vpop.f32.mrb[1].mxu1 }
 0x1d5   :  { %v331_v57 = vpop.f32.mrb[2].mxu1 }
 0x1d6   :  { %vm334_vm2 = vcmp.gt.f32.partialorder %v329_v55, 0.0  ;;  %v335_v58 = vmul.f32 0.01, %v329_v55  ;;  %v832_v59 = vpop.f32.mrb[3].mxu1 }
 0x1d8   :  { %v336_v60 = vsel %vm334_vm2, %v329_v55, %v335_v58 }
 0x1d9   :  { %v337_v61 = vpack.c.bf16 %v336_v60, %v336_v60 }
 0x1db   :  { %850 = vmatmul.mubr.bf16.vlgmr.msra.gmra.mrb[4].mxu0 %v337_v61 }
 0x1dc   :  { %889 = vmatprep.mubr.msk.bf16.mxu0 %vm971_vm0, %v970_v2  ;;  %874 = vmatpush3.bf16.msra.mxu0 %v936_v0 }
 0x1dd   :  { %875 = vmatprep.subr.bf16.mxu0 %v970_v2 }
 0x1e0   :  { %876 = vmatpush3.bf16.msra.mxu0 %v937_v1 }
 0x1e1   :  { %877 = vmatprep.subr.bf16.mxu0 %v970_v2 }
 0x1e4   :  { %878 = vmatpush3.bf16.msra.mxu0 %v938_v3 }
 0x1e5   :  { %879 = vmatprep.subr.bf16.mxu0 %v970_v2 }
 0x1e8   :  { %880 = vmatpush3.bf16.msra.mxu0 %v939_v4 }
 0x1e9   :  { %881 = vmatprep.subr.bf16.mxu0 %v970_v2 }
 0x1ec   :  { %882 = vmatpush3.bf16.msra.mxu0 %v940_v5 }
 0x1ed   :  { %883 = vmatprep.subr.bf16.mxu0 %v970_v2 }
 0x1f0   :  { %884 = vmatpush3.bf16.msra.mxu0 %v941_v6 }
 0x1f1   :  { %885 = vmatprep.subr.bf16.mxu0 %v970_v2 }
 0x1f4   :  { %886 = vmatpush3.bf16.msra.mxu0 %v942_v16 }
 0x1f5   :  { %887 = vmatprep.subr.bf16.mxu0 %v970_v2  ;;  %v745_v2 = vld [vmem:[%s1260_s10] ss:$0 sm:$0xff] }
 0x1f8   :  { %888 = vmatpush3.bf16.msra.mxu0 %v943_v17 }
 0x2ae   :  { %v443_v8 = vpop.f32.mrb[4].mxu0 }
 0x2af   :  { %v444_v9 = vadd.f32 %v727_v7, %v443_v8  ;;  %v851_v10 = vpop.f32.mrb[5].mxu0 }
 0x2b0   :  { %v446_v11 = vpop.f32.mrb[6].mxu0 }
 0x2b1   :  { %vm449_vm3 = vcmp.gt.f32.partialorder %v444_v9, 0.0  ;;  %v450_v12 = vmul.f32 0.01, %v444_v9  ;;  %v852_v13 = vpop.f32.mrb[7].mxu0 }
 0x2b3   :  { %v451_v14 = vsel %vm449_vm3, %v444_v9, %v450_v12 }
 0x2b4   :  { %v452_v15 = vpack.c.bf16 %v451_v14, %v451_v14 }
 0x2b6   :  { %870 = vmatmul.mubr.bf16.vlgmr.msra.gmra.mrb[4].mxu1 %v452_v15 }
 0x389   :  { %v558_v19 = vpop.f32.mrb[4].mxu1 }
 0x38a   :  { %v559_v20 = vadd.f32 %v736_v18, %v558_v19  ;;  %v871_v21 = vpop.f32.mrb[5].mxu1 }
 0x38b   :  { %v561_v22 = vpop.f32.mrb[6].mxu1 }
 0x38c   :  { %vm564_vm4 = vcmp.gt.f32.partialorder %v559_v20, 0.0  ;;  %v565_v23 = vmul.f32 0.01, %v559_v20  ;;  %v872_v24 = vpop.f32.mrb[7].mxu1 }
 0x38e   :  { %v566_v25 = vsel %vm564_vm4, %v559_v20, %v565_v23 }
 0x38f   :  { %v567_v26 = vpack.c.bf16 %v566_v25, %v566_v25 }
 0x391   :  { %890 = vmatmul.mubr.bf16.vlgmr.msra.gmra.mrb[8].mxu0 %v567_v26 }
 0x464   :  { %v673_v27 = vpop.f32.mrb[8].mxu0 }
 0x465   :  { %v674_v28 = vadd.f32 %v745_v2, %v673_v27  ;;  %v891_v29 = vpop.f32.mrb[9].mxu0 }
 0x466   :  { %v676_v30 = vpop.f32.mrb[10].mxu0 }
 0x467   :  { %v680_v31 = vmin.f32 %v674_v28, 0.0  ;;  %v892_v32 = vpop.f32.mrb[11].mxu0  ;;  %vm679_vm5 = vcmp.gt.f32.partialorder %v674_v28, 0.0 }
 0x469   :  { %v681_v33 = vmul.f32 1.442695, %v680_v31 }
 0x46b   :  { %944 = vpow2.f32 %v681_v33 }
 0x475   :  { %v945_v34 = vpop.eup %944 }
 0x476   :  { %v754_v35 = vadd.f32 -1.0, %v945_v34 }
 0x478   :  { %v684_v36 = vmul.f32 0.1, %v754_v35 }
 0x47a   :  { %v685_v37 = vsel %vm679_vm5, %v674_v28, %v684_v36 }
 0x47b   :  { %686 = vst [vmem:[#allocation2] sm:$0xff] %v685_v37 }
 0x47c   :  { %957 = shalt.err (!%p954_p4)
}
 0x47d   :  { %s958_s18 = scalar_lea.hbm %s1261_s11, 128 }
 0x47e   :  { %p959_p5 = scmp.ne.s32.totalorder %s1261_s11, %s958_s18  ;;  %p962_p6 = scmp.lt.u32.totalorder %s958_s18, %s1261_s11 }
 0x480   :  { %p964_p7 = pnand %p962_p6, %p959_p5 }
 0x482   :  { %967 = shalt.err (!%p964_p7)
}
 0x483   :  { %696 = dma.vmem_to_hbm [thread:$0]  %s694_s9, 128, %s1261_s11, [#allocation3]  }
 0x484   :  { %968 = dma.done.wait [#allocation3], 128  }
 0x485   :  { %969 = vsyncadd [#allocation3], 4294967168 }
 0x486   :  { %700 = vsyncpa [#allocation3], 1 }

</bundles_post_ra>
